<compile_context>
chip_gen: v7x
topology: tpu7x:2x2x1
jax: 0.10.0
libtpu: 0.0.40
codegen_flags: <defaults>
</compile_context>

<pallas_src>
import functools

import jax
import jax.numpy as jnp
from jax.experimental import pallas as pl
from jax.experimental.pallas import tpu as pltpu


def _round_up(v, m):
    return ((v + m - 1) // m) * m


def _cdiv(a, b):
    return (a + b - 1) // b


def _generation_config():
    """Per-TPU-generation block-size target / scoped-VMEM budget / TensorCore count."""
    try:
        kind = jax.devices()[0].device_kind.lower()
    except Exception:  # no devices visible / non-TPU backend
        kind = ""
    if "v7" in kind or "7x" in kind:
        # 64 MiB physical VMEM per TC, ~3.2 TB/s HBM, 2 TensorCores per chip.
        return dict(target_block_bytes=8 << 20, vmem_limit_bytes=48 << 20,
                    parallel_cores=2)
    if "v6" in kind:
        # 128 MiB VMEM, ~1.4 TB/s HBM, 1 TensorCore.
        return dict(target_block_bytes=8 << 20, vmem_limit_bytes=64 << 20,
                    parallel_cores=1)
    if "v5 lite" in kind or "v5lite" in kind or "v5e" in kind:
        # 128 MiB VMEM, ~0.8 TB/s HBM; scoped default is 16 MiB so the explicit
        # limit is required once blocks grow past it.
        return dict(target_block_bytes=4 << 20, vmem_limit_bytes=64 << 20,
                    parallel_cores=1)
    if "v5" in kind or "v4" in kind:
        # v5p / v4: megacore (2 TensorCores per chip).
        return dict(target_block_bytes=8 << 20, vmem_limit_bytes=48 << 20,
                    parallel_cores=2)
    # Unknown: conservative defaults.
    return dict(target_block_bytes=4 << 20, vmem_limit_bytes=32 << 20,
                parallel_cores=1)


def _max_pool_kernel(x_ref, o_ref, *, n_total, nt, neg_fill):
    x = x_ref[...]                                    # (bt, nt, dt)

    if nt >= n_total:
        # Single pass over N: no accumulator needed, no padding along N possible.
        o_ref[...] = jnp.max(x, axis=1)
        return

    n_idx = pl.program_id(2)
    n_last = pl.num_programs(2) - 1

    @pl.when(n_idx == 0)
    def _():
        o_ref[...] = jnp.full(o_ref.shape, neg_fill, o_ref.dtype)

    if n_total % nt == 0:
        # All N tiles are full: never any masking.
        o_ref[...] = jnp.maximum(o_ref[...], jnp.max(x, axis=1))
    else:
        # Ragged last N tile: only the final grid step pays for the iota/where mask;
        # every earlier step takes the cheap unmasked path.
        @pl.when(n_idx < n_last)
        def _():
            o_ref[...] = jnp.maximum(o_ref[...], jnp.max(x, axis=1))

        @pl.when(n_idx == n_last)
        def _():
            row = jax.lax.broadcasted_iota(jnp.int32, x.shape, dimension=1)
            xm = jnp.where(row + n_idx * nt < n_total, x, neg_fill)
            o_ref[...] = jnp.maximum(o_ref[...], jnp.max(xm, axis=1))


def max_pooling(x, mask=None, *, target_block_bytes=None, vmem_limit_bytes=None,
                min_pallas_bytes=256 * 1024, force_pallas=False):
    """Max over dim=1 of x with shape (B, N, D) -> (B, D).

    `mask` is accepted and ignored, matching the PyTorch module. Tile sizes, the
    VMEM budget and 2-TensorCore splitting are derived per TPU generation unless
    overridden via keyword arguments.
    """
    B, N, D = x.shape
    dtype = x.dtype
    itemsize = dtype.itemsize

    total_bytes = B * N * D * itemsize
    if not force_pallas and total_bytes < min_pallas_bytes:
        # Tiny inputs (the typical MIL bag): kernel-launch / pipeline setup would
        # dominate; let XLA handle (and possibly fuse) the reduction.
        return jnp.max(x, axis=1)

    cfg = _generation_config()
    if target_block_bytes is None:
        target_block_bytes = cfg["target_block_bytes"]
    if vmem_limit_bytes is None:
        vmem_limit_bytes = cfg["vmem_limit_bytes"]
    parallel_cores = cfg["parallel_cores"]

    sub = max(8, 32 // max(itemsize, 1))         # 8 f32 / 16 bf16 / 32 int8 sublanes

    if jnp.issubdtype(dtype, jnp.floating):
        # -inf is not representable for fp8 dtypes -> fall back to finfo.min there.
        neg_fill = float("-inf") if itemsize >= 2 else float(jnp.finfo(dtype).min)
    else:
        neg_fill = int(jnp.iinfo(dtype).min)

    # --- D (lane) tile: lane-dense 128-multiple. Large D is tiled at 2048; the last
    #     D tile may be ragged (its store is masked, all other stores stay unmasked).
    dt = 2048 if D > 2048 else D

    # --- B (sublane) tile: fill sublanes of the output block and grow toward the
    #     target input-block size to amortize the ~0.35 us per-grid-step overhead.
    b_full = _round_up(B, sub)
    bt = sub
    while bt < b_full and bt * 2 * N * dt * itemsize <= target_block_bytes:
        bt *= 2
    bt = min(bt, b_full)
    if bt >= B:
        bt = B       # full-B block is always a legal block dim and avoids padded rows

    # --- 2-TensorCore chips: guarantee the parallel grid extent (B tiles x D tiles)
    #     is >= 2 so both cores get a share of the HBM stream.
    if parallel_cores >= 2 and _cdiv(B, bt) * _cdiv(D, dt) < 2:
        if dt == D and D >= 256:
            dt = _round_up(_cdiv(D, 2), 128)      # split into two lane-dense D tiles
        elif bt >= B and B > sub:
            bt = _round_up(_cdiv(B, 2), sub)      # split into two B tiles
        # TODO(synk): for tiny (B, D) with huge N, split N into two parallel
        # partial-max chunks and combine with jnp.maximum in the wrapper.

    # --- N (reduction) tile: whole bag if it fits the target block, otherwise tile
    #     and accumulate across the grid-last "arbitrary" axis (VMEM-resident output).
    if bt * N * dt * itemsize <= target_block_bytes:
        nt = N
    else:
        nt = target_block_bytes // (bt * dt * itemsize)
        nt = max(sub, (nt // sub) * sub)
        nt = min(nt, N)

    grid = (_cdiv(B, bt), _cdiv(D, dt), _cdiv(N, nt))

    kernel = functools.partial(_max_pool_kernel, n_total=N, nt=nt, neg_fill=neg_fill)

    bytes_accessed = B * N * D * itemsize + B * D * itemsize

    return pl.pallas_call(
        kernel,
        out_shape=jax.ShapeDtypeStruct((B, D), dtype),
        grid_spec=pl.GridSpec(
            grid=grid,
            in_specs=[pl.BlockSpec((bt, nt, dt), lambda b, d, n: (b, n, d))],
            out_specs=pl.BlockSpec((bt, dt), lambda b, d, n: (b, d)),
        ),
        compiler_params=pltpu.CompilerParams(
            dimension_semantics=("parallel", "parallel", "arbitrary"),
            vmem_limit_bytes=int(vmem_limit_bytes),
        ),
        cost_estimate=pl.CostEstimate(
            flops=B * N * D, transcendentals=0, bytes_accessed=bytes_accessed
        ),
    )(x)


if __name__ == "__main__":
    key = jax.random.PRNGKey(0)

    # 1) Primary small MIL-like case: 4 bags, 16 instances, 256 features (f32).
    #    force_pallas=True so the Pallas kernel itself is exercised even though the
    #    auto heuristic would bypass such a tiny input.
    B, N, D = 4, 16, 256
    x = jax.random.normal(key, (B, N, D), dtype=jnp.float32)
    out = jax.block_until_ready(max_pooling(x, force_pallas=True))
    ref = jnp.max(x, axis=1)
    assert out.shape == (B, D)
    assert jnp.array_equal(out, ref), "mismatch vs reference (f32, single pass)"

    # 2) Auto path: same input routed through the small-input bypass.
    out_auto = jax.block_until_ready(max_pooling(x))
    assert jnp.array_equal(out_auto, ref), "mismatch vs reference (bypass path)"

    # 3) Tiled-N accumulator path with a ragged last N tile (last-step-only mask).
    x2 = jax.random.normal(jax.random.PRNGKey(0), (3, 20, 128), dtype=jnp.float32)
    out2 = jax.block_until_ready(
        max_pooling(x2, target_block_bytes=4096, force_pallas=True))
    assert jnp.array_equal(out2, jnp.max(x2, axis=1)), "mismatch vs reference (tiled N)"

    # 4) Ragged last D tile (D > 2048, not a multiple of the 2048-wide D tile).
    x3 = jax.random.normal(jax.random.PRNGKey(0), (2, 8, 2200), dtype=jnp.float32)
    out3 = jax.block_until_ready(max_pooling(x3, force_pallas=True))
    assert jnp.array_equal(out3, jnp.max(x3, axis=1)), "mismatch vs reference (ragged D)"

    # 5) Narrow-dtype path (bf16 end-to-end).
    x4 = jax.random.normal(jax.random.PRNGKey(0), (2, 8, 128), dtype=jnp.bfloat16)
    out4 = jax.block_until_ready(max_pooling(x4, force_pallas=True))
    assert jnp.array_equal(out4, jnp.max(x4, axis=1)), "mismatch vs reference (bf16)"

    print("KERNEL_OK")
</pallas_src>

<mosaic_0001>
module attributes {stable_mosaic.version = 11 : i64} {
  func.func @_max_pool_kernel(%arg0: i32, %arg1: i32, %arg2: i32, %arg3: memref<4x16x256xf32, #tpu.memory_space<vmem>>, %arg4: memref<4x256xf32, #tpu.memory_space<vmem>>) attributes {dimension_semantics = [#tpu.dimension_semantics<parallel>, #tpu.dimension_semantics<parallel>, #tpu.dimension_semantics<arbitrary>], iteration_bounds = array<i64: 1, 1, 1>, scalar_prefetch = 0 : i64, scratch_operands = 0 : i64, tpu.core_type = #tpu.core_type<tc>, window_params = [{transform_indices = @transform_0, window_bounds = array<i64: 4, 16, 256>}, {transform_indices = @transform_1, window_bounds = array<i64: 4, 256>}]} {
    %c0 = arith.constant 0 : index
    %c0_0 = arith.constant 0 : index
    %c0_1 = arith.constant 0 : index
    %0 = vector.load %arg3[%c0, %c0_0, %c0_1] : memref<4x16x256xf32, #tpu.memory_space<vmem>>, vector<4x16x256xf32>
    %cst = arith.constant dense<0xFF800000> : vector<4x256xf32>
    %1 = vector.multi_reduction <maximumf>, %0, %cst [1] : vector<4x16x256xf32> to vector<4x256xf32>
    %c0_2 = arith.constant 0 : index
    %c0_3 = arith.constant 0 : index
    %2 = vector.load %arg4[%c0_2, %c0_3] : memref<4x256xf32, #tpu.memory_space<vmem>>, vector<4x256xf32>
    tpu.vector_store %arg4[%c0_2, %c0_3], %1 {strides = array<i32>} : memref<4x256xf32, #tpu.memory_space<vmem>>, vector<4x256xf32>,
    return
  }
  func.func @transform_0(%arg0: i32, %arg1: i32, %arg2: i32) -> (i32, i32, i32) {
    %c0_i32 = arith.constant 0 : i32
    return %arg0, %arg2, %arg1 : i32, i32, i32
  }
  func.func @transform_1(%arg0: i32, %arg1: i32, %arg2: i32) -> (i32, i32) {
    %c0_i32 = arith.constant 0 : i32
    return %arg0, %arg1 : i32, i32
  }
}

</mosaic_0001>

<bundles_post_ra>
// kernel: tpu_custom_call.1
= control target key start
LH: loop header
LB: loop body
LE: loop exit
PB: predicated region body
PF: predicated region fallthrough
CT: control target
= control target key end

     0   :  { %6 = vsyncpa [#allocation3], 0  ;;  %s229_s0 = inlined_call_operand.hbm [shape: f32[4,16,256], index: 0, kind: input, shape index: {}]   ;;  %s230_s1 = inlined_call_operand.hbm [shape: f32[4,256], index: 1, kind: output, shape index: {}]  }
   0x1   :  { %7 = vsyncpa [#allocation4], 0  ;;  %s191_s6 = smov [#allocation2]   ;;  %s143_s10 = scalar_lea.hbm %s229_s0, 2048 }
   0x2   :  { %s13_s7 = sshll.u32 %s191_s6, 4  ;;  %p144_p0 = scmp.ne.s32.totalorder %s229_s0, %s143_s10  ;;  %s14_s7 = int_to_ptr.vmem [resolvable:$true] %s13_s7 }
   0x3   :  { %p147_p1 = scmp.lt.u32.totalorder %s143_s10, %s229_s0 }
   0x5   :  { %p149_p2 = pnand %p147_p1, %p144_p0 }
   0x7   :  { %152 = shalt.err (!%p149_p2)
}
   0x8   :  { %s153_s15 = scalar_lea.vmem %s14_s7, 2048  ;;  %p158_p4 = scmp.lt.s32.totalorder %s14_s7, %s14_s7 }
   0x9   :  { %p154_p3 = scmp.ne.s32.totalorder %s14_s7, %s153_s15  ;;  %p159_p5 = scmp.lt.s32.totalorder %s153_s15, %s153_s15 }
   0xb   :  { %p160_p6 = por %p159_p5, %p158_p4 }
   0xd   :  { %p161_p7 = pnand %p160_p6, %p154_p3 }
   0xf   :  { %164 = shalt.err (!%p161_p7)
}
  0x10   :  { %s192_s16 = smov 256   ;;  %s193_s17 = smov 16  }
  0x11   :  { %19 = dma.hbm_to_vmem [thread:$0]  %s229_s0, 2048, %s14_s7, [#allocation3], %s192_s16, %s192_s16, %s193_s17  }
  0x12   :  { %187 = dma.done.wait [#allocation3], 2048  }
  0x13   :  { %188 = vsyncadd [#allocation3], 4294965248  ;;  %v23_v0 = vld [vmem:[#allocation2] sm:$0xff]  ;;  %v24_v1 = vld [vmem:[#allocation2 + $0x8] sm:$0xff]  ;;  %vm108_vm0 = vcmask 1041409   ;;  %vm110_vm1 = vcmask 1045509  }
  0x14   :  { %v25_v2 = vld [vmem:[#allocation2 + $0x10] sm:$0xff]  ;;  %v26_v3 = vld [vmem:[#allocation2 + $0x18] sm:$0xff]  ;;  %v27_v4 = vld [vmem:[#allocation2 + $0x20] sm:$0xff]  ;;  %vm113_vm2 = vcmask 1042434   ;;  %vm115_vm3 = vcmask 1046534   ;;  %vm118_vm4 = vcmask 1043459  }
  0x15   :  { %v28_v5 = vld [vmem:[#allocation2 + $0x28] sm:$0xff]  ;;  %v39_v6 = vmax.f32 %v23_v0, %v25_v2  ;;  %v29_v7 = vld [vmem:[#allocation2 + $0x30] sm:$0xff]  ;;  %v30_v8 = vld [vmem:[#allocation2 + $0x38] sm:$0xff]  ;;  %v46_v10 = vmax.f32 %v24_v1, %v26_v3  ;;  %s194_s0 = smov [#allocation5]   ;;  %vm120_vm5 = vcmask 1047559  }
  0x16   :  { %v31_v9 = vld [vmem:[#allocation2 + $0x40] sm:$0xff]  ;;  %v32_v11 = vld [vmem:[#allocation2 + $0x48] sm:$0xff]  ;;  %v33_v12 = vld [vmem:[#allocation2 + $0x50] sm:$0xff]  ;;  %v53_v15 = vmax.f32 %v27_v4, %v29_v7  ;;  %v60_v16 = vmax.f32 %v28_v5, %v30_v8  ;;  %s130_s20 = sshll.u32 %s194_s0, 4  ;;  %s131_s20 = int_to_ptr.vmem [resolvable:$true] %s130_s20 }
  0x17   :  { %v34_v13 = vld [vmem:[#allocation2 + $0x58] sm:$0xff]  ;;  %v40_v14 = vrot.slane %v39_v6, 4  ;;  %v35_v17 = vld [vmem:[#allocation2 + $0x60] sm:$0xff]  ;;  %v36_v18 = vld [vmem:[#allocation2 + $0x68] sm:$0xff]  ;;  %v47_v20 = vrot.slane %v46_v10, 4  ;;  %v67_v21 = vmax.f32 %v31_v9, %v33_v12  ;;  %s165_s21 = scalar_lea.vmem %s131_s20, 128  ;;  %p170_p9 = scmp.lt.s32.totalorder %s131_s20, %s131_s20 }
  0x18   :  { %v37_v19 = vld [vmem:[#allocation2 + $0x70] sm:$0xff]  ;;  %v74_v22 = vmax.f32 %v32_v11, %v34_v13  ;;  %v38_v23 = vld [vmem:[#allocation2 + $0x78] sm:$0xff]  ;;  %v54_v25 = vrot.slane %v53_v15, 4  ;;  %v61_v26 = vrot.slane %v60_v16, 4  ;;  %p166_p8 = scmp.ne.s32.totalorder %s131_s20, %s165_s21  ;;  %p171_p10 = scmp.lt.s32.totalorder %s165_s21, %s165_s21 }
  0x19   :  { %v41_v24 = vmax.f32 %v39_v6, %v40_v14  ;;  %v81_v27 = vmax.f32 %v35_v17, %v37_v19  ;;  %v48_v28 = vmax.f32 %v46_v10, %v47_v20  ;;  %v68_v29 = vrot.slane %v67_v21, 4 }
  0x1a   :  { %v75_v30 = vrot.slane %v74_v22, 4  ;;  %v88_v31 = vmax.f32 %v36_v18, %v38_v23  ;;  %v55_v33 = vmax.f32 %v53_v15, %v54_v25  ;;  %v62_v34 = vmax.f32 %v60_v16, %v61_v26  ;;  %p172_p11 = por %p171_p10, %p170_p9 }
  0x1b   :  { %v42_v32 = vrot.slane %v41_v24, 2  ;;  %v82_v35 = vrot.slane %v81_v27, 4  ;;  %v49_v36 = vrot.slane %v48_v28, 2  ;;  %v69_v37 = vmax.f32 %v67_v21, %v68_v29 }
  0x1c   :  { %v76_v38 = vmax.f32 %v74_v22, %v75_v30  ;;  %v89_v39 = vrot.slane %v88_v31, 4  ;;  %v56_v41 = vrot.slane %v55_v33, 2  ;;  %v63_v42 = vrot.slane %v62_v34, 2  ;;  %p173_p12 = pnand %p172_p11, %p166_p8 }
  0x1d   :  { %v43_v40 = vmax.f32 %v41_v24, %v42_v32  ;;  %v83_v43 = vmax.f32 %v81_v27, %v82_v35  ;;  %v50_v44 = vmax.f32 %v48_v28, %v49_v36  ;;  %v70_v45 = vrot.slane %v69_v37, 2 }
  0x1e   :  { %v77_v46 = vrot.slane %v76_v38, 2  ;;  %v90_v47 = vmax.f32 %v88_v31, %v89_v39  ;;  %v57_v49 = vmax.f32 %v55_v33, %v56_v41  ;;  %v64_v50 = vmax.f32 %v62_v34, %v63_v42 }
  0x1f   :  { %v44_v48 = vrot.slane %v43_v40, 1  ;;  %v84_v51 = vrot.slane %v83_v43, 2  ;;  %v51_v52 = vrot.slane %v50_v44, 1  ;;  %v71_v53 = vmax.f32 %v69_v37, %v70_v45 }
  0x20   :  { %v78_v54 = vmax.f32 %v76_v38, %v77_v46  ;;  %v91_v55 = vrot.slane %v90_v47, 2  ;;  %v58_v57 = vrot.slane %v57_v49, 1  ;;  %v65_v58 = vrot.slane %v64_v50, 1 }
  0x21   :  { %v45_v56 = vmax.f32 %v43_v40, %v44_v48  ;;  %v85_v59 = vmax.f32 %v83_v43, %v84_v51  ;;  %v52_v60 = vmax.f32 %v50_v44, %v51_v52  ;;  %v72_v61 = vrot.slane %v71_v53, 1 }
  0x22   :  { %v79_v62 = vrot.slane %v78_v54, 1  ;;  %v92_v63 = vmax.f32 %v90_v47, %v91_v55  ;;  %v59_v0 = vmax.f32 %v57_v49, %v58_v57  ;;  %v66_v1 = vmax.f32 %v64_v50, %v65_v58 }
  0x23   :  { %v86_v2 = vrot.slane %v85_v59, 1  ;;  %v73_v3 = vmax.f32 %v71_v53, %v72_v61  ;;  %v103_v7 = vcombine.low %v45_v56, %v52_v60 }
  0x24   :  { %v80_v4 = vmax.f32 %v78_v54, %v79_v62  ;;  %v93_v5 = vrot.slane %v92_v63, 1  ;;  %v104_v8 = vcombine.low %v59_v0, %v66_v1 }
  0x25   :  { %v87_v6 = vmax.f32 %v85_v59, %v86_v2 }
  0x26   :  { %v94_v9 = vmax.f32 %v92_v63, %v93_v5  ;;  %v105_v10 = vcombine.low %v73_v3, %v80_v4  ;;  %v107_v11 = vrot.slane %v104_v8, 7 }
  0x28   :  { %v106_v12 = vcombine.low %v87_v6, %v94_v9  ;;  %v112_v13 = vrot.slane %v105_v10, 6  ;;  %v109_v14 = vsel %vm108_vm0, %v107_v11, %v103_v7 }
  0x29   :  { %v111_v15 = vsel %vm110_vm1, %v107_v11, %v109_v14 }
  0x2a   :  { %v117_v16 = vrot.slane %v106_v12, 5  ;;  %v114_v17 = vsel %vm113_vm2, %v112_v13, %v111_v15 }
  0x2b   :  { %v116_v18 = vsel %vm115_vm3, %v112_v13, %v114_v17 }
  0x2c   :  { %v119_v19 = vsel %vm118_vm4, %v117_v16, %v116_v18 }
  0x2d   :  { %v121_v20 = vsel %vm120_vm5, %v117_v16, %v119_v19 }
  0x2e   :  { %123 = vst [vmem:[#allocation5] sm:$0xff] %v121_v20 }
  0x2f   :  { %176 = shalt.err (!%p173_p12)
}
  0x30   :  { %s177_s24 = scalar_lea.hbm %s230_s1, 128 }
  0x31   :  { %p178_p13 = scmp.ne.s32.totalorder %s230_s1, %s177_s24  ;;  %p181_p0 = scmp.lt.u32.totalorder %s177_s24, %s230_s1 }
  0x33   :  { %p183_p1 = pnand %p181_p0, %p178_p13 }
  0x35   :  { %186 = shalt.err (!%p183_p1)
}
  0x36   :  { %133 = dma.vmem_to_hbm [thread:$0]  %s131_s20, 128, %s230_s1, [#allocation4]  }
  0x37   :  { %189 = dma.done.wait [#allocation4], 128  }
  0x38   :  { %190 = vsyncadd [#allocation4], 4294967168 }
  0x39   :  { %137 = vsyncpa [#allocation3], 1 }
  0x3a   :  { %138 = vsyncpa [#allocation4], 1 }

</bundles_post_ra>
